<compile_context>
chip_gen: v7x
topology: tpu7x:2x2x1
jax: 0.10.0
libtpu: 0.0.40
codegen_flags: <defaults>
</compile_context>

<pallas_src>
import functools

import jax
import jax.numpy as jnp
from jax.experimental import pallas as pl
from jax.experimental.pallas import tpu as pltpu


def _round_up(x, m):
    return ((x + m - 1) // m) * m


def _mcrmse_kernel(yhat_ref, y_ref, out_ref, acc_ref, *, n_valid, num_scored, eps):
    """One grid step of the MCRMSE reduction.

    yhat_ref / y_ref : (C, tm, 128) lane-dense tiles of the flattened inputs.
    out_ref          : (1, 1) f32 scalar loss (resident across the grid).
    acc_ref          : (C, tm, 128) f32 VMEM scratch of elementwise partial sums.
    """
    t = pl.program_id(0)

    @pl.when(t == 0)
    def _init():
        acc_ref[...] = jnp.zeros_like(acc_ref)

    # Hot loop: full-tile pass, pure VPU multiply-add, no per-step cross-lane work.
    d = yhat_ref[...].astype(jnp.float32) - y_ref[...].astype(jnp.float32)
    acc_ref[...] += d * d

    @pl.when(t == pl.num_programs(0) - 1)
    def _finalize():
        # Deferred reduction (runs once): collapse rows, then lanes, per channel.
        part = jnp.sum(acc_ref[...], axis=1)               # (C, 128)
        sse = jnp.sum(part, axis=-1, keepdims=True)        # (C, 1) sum of sq. errors
        rmse = jnp.sqrt(sse * (1.0 / n_valid) + eps)       # (C, 1) per-channel RMSE
        out_ref[...] = jnp.sum(rmse, keepdims=True) * (1.0 / num_scored)  # (1, 1)


def mcrmse_loss(yhat, y, num_scored=2, eps=1e-6, rows_per_tile=1024):
    """Pallas MCRMSE loss.  yhat, y: (B, C, S) with C == num_scored."""
    assert yhat.shape == y.shape
    B, C, S = yhat.shape
    assert C == num_scored
    assert rows_per_tile % 8 == 0

    N = B * S                                   # elements per scored channel
    M = _round_up(N, 128) // 128                # number of 128-lane rows
    tm = min(rows_per_tile, _round_up(M, 8))    # rows per tile (multiple of 8)
    Mp = _round_up(M, tm)                       # padded row count
    Np = Mp * 128                               # padded flattened length

    def to_slab(x):
        # (B, C, S) -> channel-major, flattened, zero-padded, lane-dense (C, Mp, 128)
        x2 = jnp.transpose(x, (1, 0, 2)).reshape(C, N)
        x2 = jnp.pad(x2, ((0, 0), (0, Np - N)))
        return x2.reshape(C, Mp, 128)

    yhat3 = to_slab(yhat)
    y3 = to_slab(y)

    kernel = functools.partial(
        _mcrmse_kernel,
        n_valid=float(N),
        num_scored=float(num_scored),
        eps=float(eps),
    )

    out = pl.pallas_call(
        kernel,
        out_shape=jax.ShapeDtypeStruct((1, 1), jnp.float32),
        grid_spec=pltpu.PrefetchScalarGridSpec(
            num_scalar_prefetch=0,
            grid=(Mp // tm,),
            in_specs=[
                pl.BlockSpec((C, tm, 128), lambda t: (0, t, 0)),
                pl.BlockSpec((C, tm, 128), lambda t: (0, t, 0)),
            ],
            out_specs=pl.BlockSpec((1, 1), lambda t: (0, 0)),
            scratch_shapes=[pltpu.VMEM((C, tm, 128), jnp.float32)],
        ),
        compiler_params=pltpu.CompilerParams(
            dimension_semantics=("arbitrary",),
        ),
    )(yhat3, y3)
    return out[0, 0]


def mcrmse_loss_ref(yhat, y, num_scored=2, eps=1e-6):
    # pure-JAX reference mirroring the PyTorch forward
    score = 0.0
    for i in range(num_scored):
        mse = jnp.mean((yhat[:, i].astype(jnp.float32) - y[:, i].astype(jnp.float32)) ** 2)
        score = score + jnp.sqrt(mse + eps) / num_scored
    return score


if __name__ == "__main__":
    key = jax.random.PRNGKey(0)
    k1, k2 = jax.random.split(key)

    B, C, S = 8, 2, 16  # batch, num_scored channels, seq
    yhat = jax.random.normal(k1, (B, C, S), dtype=jnp.float32)
    y = jax.random.normal(k2, (B, C, S), dtype=jnp.float32)

    loss = mcrmse_loss(yhat, y, num_scored=C)
    jax.block_until_ready(loss)

    ref = mcrmse_loss_ref(yhat, y, num_scored=C)
    assert jnp.allclose(loss, ref, rtol=1e-5, atol=1e-6), (loss, ref)

    print("KERNEL_OK")
</pallas_src>

<mosaic_0001>
module attributes {stable_mosaic.version = 11 : i64} {
  func.func @_mcrmse_kernel(%arg0: i32, %arg1: memref<2x8x128xf32, #tpu.memory_space<vmem>>, %arg2: memref<2x8x128xf32, #tpu.memory_space<vmem>>, %arg3: memref<1x1xf32, #tpu.memory_space<vmem>>, %arg4: memref<2x8x128xf32, #tpu.memory_space<vmem>>) attributes {dimension_semantics = [#tpu.dimension_semantics<arbitrary>], iteration_bounds = array<i64: 1>, scalar_prefetch = 0 : i64, scratch_operands = 1 : i64, tpu.core_type = #tpu.core_type<tc>, window_params = [{transform_indices = @transform_0, window_bounds = array<i64: 2, 8, 128>}, {transform_indices = @transform_1, window_bounds = array<i64: 2, 8, 128>}, {pipeline_mode = #tpu.pipeline_mode<synchronous>, transform_indices = @transform_2, window_bounds = array<i64: 1, 1>}]} {
    %c0_i32 = arith.constant 0 : i32
    %0 = arith.cmpi eq, %arg0, %c0_i32 : i32
    %1 = arith.extui %0 : i1 to i32
    %c0_i32_0 = arith.constant 0 : i32
    %2 = arith.cmpi ne, %1, %c0_i32_0 : i32
    scf.if %2 {
      %cst = arith.constant 0.000000e+00 : f32
      %13 = vector.broadcast %cst : f32 to vector<2x8x128xf32>
      %c0_14 = arith.constant 0 : index
      %c0_15 = arith.constant 0 : index
      %c0_16 = arith.constant 0 : index
      %14 = vector.load %arg4[%c0_14, %c0_15, %c0_16] : memref<2x8x128xf32, #tpu.memory_space<vmem>>, vector<2x8x128xf32>
      tpu.vector_store %arg4[%c0_14, %c0_15, %c0_16], %13 {strides = array<i32>} : memref<2x8x128xf32, #tpu.memory_space<vmem>>, vector<2x8x128xf32>,
    } else {
    }
    %c0 = arith.constant 0 : index
    %c0_1 = arith.constant 0 : index
    %c0_2 = arith.constant 0 : index
    %3 = vector.load %arg1[%c0, %c0_1, %c0_2] : memref<2x8x128xf32, #tpu.memory_space<vmem>>, vector<2x8x128xf32>
    %c0_3 = arith.constant 0 : index
    %c0_4 = arith.constant 0 : index
    %c0_5 = arith.constant 0 : index
    %4 = vector.load %arg2[%c0_3, %c0_4, %c0_5] : memref<2x8x128xf32, #tpu.memory_space<vmem>>, vector<2x8x128xf32>
    %5 = arith.subf %3, %4 : vector<2x8x128xf32>
    %c0_6 = arith.constant 0 : index
    %c0_7 = arith.constant 0 : index
    %c0_8 = arith.constant 0 : index
    %6 = vector.load %arg4[%c0_6, %c0_7, %c0_8] : memref<2x8x128xf32, #tpu.memory_space<vmem>>, vector<2x8x128xf32>
    %7 = arith.mulf %5, %5 : vector<2x8x128xf32>
    %8 = arith.addf %6, %7 : vector<2x8x128xf32>
    %c0_9 = arith.constant 0 : index
    %c0_10 = arith.constant 0 : index
    %c0_11 = arith.constant 0 : index
    %9 = vector.load %arg4[%c0_9, %c0_10, %c0_11] : memref<2x8x128xf32, #tpu.memory_space<vmem>>, vector<2x8x128xf32>
    tpu.vector_store %arg4[%c0_9, %c0_10, %c0_11], %8 {strides = array<i32>} : memref<2x8x128xf32, #tpu.memory_space<vmem>>, vector<2x8x128xf32>,
    %c0_i32_12 = arith.constant 0 : i32
    %10 = arith.cmpi eq, %arg0, %c0_i32_12 : i32
    %11 = arith.extui %10 : i1 to i32
    %c0_i32_13 = arith.constant 0 : i32
    %12 = arith.cmpi ne, %11, %c0_i32_13 : i32
    scf.if %12 {
      %c0_14 = arith.constant 0 : index
      %c0_15 = arith.constant 0 : index
      %c0_16 = arith.constant 0 : index
      %13 = vector.load %arg4[%c0_14, %c0_15, %c0_16] : memref<2x8x128xf32, #tpu.memory_space<vmem>>, vector<2x8x128xf32>
      %cst = arith.constant dense<0.000000e+00> : vector<2x128xf32>
      %14 = vector.multi_reduction <add>, %13, %cst [1] : vector<2x8x128xf32> to vector<2x128xf32>
      %cst_17 = arith.constant dense<0.000000e+00> : vector<2xf32>
      %15 = vector.multi_reduction <add>, %14, %cst_17 [1] : vector<2x128xf32> to vector<2xf32>
      %16 = vector.shape_cast %15 : vector<2xf32> to vector<2x1xf32>
      %cst_18 = arith.constant 7.812500e-03 : f32
      %17 = vector.broadcast %cst_18 : f32 to vector<2x1xf32>
      %18 = arith.mulf %16, %17 : vector<2x1xf32>
      %cst_19 = arith.constant 9.99999997E-7 : f32
      %19 = vector.broadcast %cst_19 : f32 to vector<2x1xf32>
      %20 = arith.addf %18, %19 : vector<2x1xf32>
      %21 = math.sqrt %20 : vector<2x1xf32>
      %22 = vector.shape_cast %21 : vector<2x1xf32> to vector<1x2x1xf32>
      %cst_20 = arith.constant dense<0.000000e+00> : vector<1xf32>
      %23 = vector.multi_reduction <add>, %22, %cst_20 [1, 2] : vector<1x2x1xf32> to vector<1xf32>
      %24 = vector.shape_cast %23 : vector<1xf32> to vector<1x1x1xf32>
      %25 = vector.extract %24[0, 0, 0] : f32 from vector<1x1x1xf32>
      %26 = vector.broadcast %25 : f32 to vector<1x1xf32>
      %cst_21 = arith.constant 5.000000e-01 : f32
      %27 = vector.broadcast %cst_21 : f32 to vector<1x1xf32>
      %28 = arith.mulf %26, %27 : vector<1x1xf32>
      %c0_22 = arith.constant 0 : index
      %c0_23 = arith.constant 0 : index
      %29 = vector.load %arg3[%c0_22, %c0_23] : memref<1x1xf32, #tpu.memory_space<vmem>>, vector<1x1xf32>
      tpu.vector_store %arg3[%c0_22, %c0_23], %28 {strides = array<i32>} : memref<1x1xf32, #tpu.memory_space<vmem>>, vector<1x1xf32>,
    } else {
    }
    return
  }
  func.func @transform_0(%arg0: i32) -> (i32, i32, i32) {
    %c0_i32 = arith.constant 0 : i32
    %c0_i32_0 = arith.constant 0 : i32
    %c0_i32_1 = arith.constant 0 : i32
    return %c0_i32, %arg0, %c0_i32_0 : i32, i32, i32
  }
  func.func @transform_1(%arg0: i32) -> (i32, i32, i32) {
    %c0_i32 = arith.constant 0 : i32
    %c0_i32_0 = arith.constant 0 : i32
    %c0_i32_1 = arith.constant 0 : i32
    return %c0_i32, %arg0, %c0_i32_0 : i32, i32, i32
  }
  func.func @transform_2(%arg0: i32) -> (i32, i32) {
    %c0_i32 = arith.constant 0 : i32
    %c0_i32_0 = arith.constant 0 : i32
    %c0_i32_1 = arith.constant 0 : i32
    return %c0_i32, %c0_i32_0 : i32, i32
  }
}

</mosaic_0001>

<bundles_post_ra>
// kernel: tpu_custom_call.1
= control target key start
LH: loop header
LB: loop body
LE: loop exit
PB: predicated region body
PF: predicated region fallthrough
CT: control target
= control target key end

     0   :  { %7 = vsyncpa [#allocation4], 0  ;;  %s263_s0 = inlined_call_operand.hbm [shape: f32[2,8,128], index: 0, kind: input, shape index: {}]   ;;  %s264_s1 = inlined_call_operand.hbm [shape: f32[2,8,128], index: 1, kind: input, shape index: {}]   ;;  %s265_s2 = inlined_call_operand.hbm [shape: f32[1,1], index: 2, kind: output, shape index: {}]  }
   0x1   :  { %8 = vsyncpa [#allocation7], 0 }
   0x2   :  { %9 = vsyncpa [#allocation5], 0  ;;  %s207_s9 = smov [#allocation3]   ;;  %s135_s13 = scalar_lea.hbm %s263_s0, 256 }
   0x3   :  { %s15_s10 = sshll.u32 %s207_s9, 4  ;;  %p136_p0 = scmp.ne.s32.totalorder %s263_s0, %s135_s13  ;;  %s16_s10 = int_to_ptr.vmem [resolvable:$true] %s15_s10 }
   0x4   :  { %p139_p1 = scmp.lt.u32.totalorder %s135_s13, %s263_s0 }
   0x6   :  { %p141_p2 = pnand %p139_p1, %p136_p0 }
   0x8   :  { %144 = shalt.err (!%p141_p2)
}
   0x9   :  { %s145_s18 = scalar_lea.vmem %s16_s10, 256  ;;  %p150_p4 = scmp.lt.s32.totalorder %s16_s10, %s16_s10 }
   0xa   :  { %p146_p3 = scmp.ne.s32.totalorder %s16_s10, %s145_s18  ;;  %p151_p5 = scmp.lt.s32.totalorder %s145_s18, %s145_s18 }
   0xc   :  { %p152_p6 = por %p151_p5, %p150_p4 }
   0xe   :  { %p153_p7 = pnand %p152_p6, %p146_p3 }
  0x10   :  { %156 = shalt.err (!%p153_p7)
}
  0x11   :  { %s208_s19 = smov 128   ;;  %s209_s20 = smov 8  }
  0x12   :  { %21 = dma.hbm_to_vmem [thread:$0]  %s263_s0, 256, %s16_s10, [#allocation4], %s208_s19, %s208_s19, %s209_s20  }
  0x13   :  { %s210_s23 = smov [#allocation6]   ;;  %s157_s27 = scalar_lea.hbm %s264_s1, 256 }
  0x14   :  { %s27_s24 = sshll.u32 %s210_s23, 4  ;;  %p158_p8 = scmp.ne.s32.totalorder %s264_s1, %s157_s27  ;;  %s28_s24 = int_to_ptr.vmem [resolvable:$true] %s27_s24 }
  0x15   :  { %p161_p9 = scmp.lt.u32.totalorder %s157_s27, %s264_s1 }
  0x17   :  { %p163_p10 = pnand %p161_p9, %p158_p8 }
  0x19   :  { %166 = shalt.err (!%p163_p10)
}
  0x1a   :  { %s167_s4 = scalar_lea.vmem %s28_s24, 256  ;;  %p172_p12 = scmp.lt.s32.totalorder %s28_s24, %s28_s24 }
  0x1b   :  { %p168_p11 = scmp.ne.s32.totalorder %s28_s24, %s167_s4  ;;  %p173_p13 = scmp.lt.s32.totalorder %s167_s4, %s167_s4 }
  0x1d   :  { %p174_p0 = por %p173_p13, %p172_p12 }
  0x1f   :  { %p175_p1 = pnand %p174_p0, %p168_p11 }
  0x21   :  { %178 = shalt.err (!%p175_p1)
}
  0x22   :  { %33 = dma.hbm_to_vmem [thread:$0]  %s264_s1, 256, %s28_s24, [#allocation7], %s208_s19, %s208_s19, %s209_s20  }
  0x23   :  { %201 = dma.done.wait [#allocation4], 256  }
  0x24   :  { %202 = vsyncadd [#allocation4], 4294967040 }
  0x25   :  { %203 = dma.done.wait [#allocation7], 256  }
  0x26   :  { %204 = vsyncadd [#allocation7], 4294967040  ;;  %v46_v0 = vld [vmem:[#allocation3] sm:$0xff]  ;;  %v47_v1 = vld [vmem:[#allocation3 + $0x8] sm:$0xff]  ;;  %vm79_vm0 = vcmask 1041409   ;;  %vm82_vm1 = vcmask 1041408  }
  0x27   :  { %v48_v2 = vld [vmem:[#allocation6] sm:$0xff]  ;;  %v49_v3 = vld [vmem:[#allocation6 + $0x8] sm:$0xff]  ;;  %vm95_vm3 = vcmask 1024   ;;  %s211_s1 = smov [#allocation8]   ;;  %vm108_vm5 = vcmask 0  }
  0x28   :  { %v50_v4 = vsub.f32 %v46_v0, %v48_v2  ;;  %v51_v5 = vsub.f32 %v47_v1, %v49_v3  ;;  %s116_s6 = sshll.u32 %s211_s1, 4  ;;  %s117_s6 = int_to_ptr.vmem [resolvable:$true] %s116_s6 }
  0x29   :  { %s179_s8 = scalar_lea.vmem %s117_s6, 16  ;;  %s183_s9 = scalar_lea.vmem %s117_s6, 32 }
  0x2a   :  { %v54_v6 = vmul.f32 %v50_v4, %v50_v4  ;;  %v55_v7 = vmul.f32 %v51_v5, %v51_v5  ;;  %p180_p2 = scmp.ne.s32.totalorder %s117_s6, %s179_s8  ;;  %p184_p3 = scmp.lt.s32.totalorder %s117_s6, %s117_s6 }
  0x2b   :  { %p185_p4 = scmp.lt.s32.totalorder %s183_s9, %s179_s8 }
  0x2c   :  { %v65_v8 = vrot.slane %v54_v6, 4  ;;  %v71_v9 = vrot.slane %v55_v7, 4 }
  0x2d   :  { %p186_p5 = por %p185_p4, %p184_p3 }
  0x2e   :  { %v66_v10 = vadd.f32 %v65_v8, %v54_v6  ;;  %v72_v11 = vadd.f32 %v71_v9, %v55_v7 }
  0x2f   :  { %p187_p6 = pnand %p186_p5, %p180_p2 }
  0x30   :  { %v67_v12 = vrot.slane %v66_v10, 2  ;;  %v73_v13 = vrot.slane %v72_v11, 2 }
  0x32   :  { %v68_v14 = vadd.f32 %v67_v12, %v66_v10  ;;  %v74_v15 = vadd.f32 %v73_v13, %v72_v11 }
  0x34   :  { %v69_v16 = vrot.slane %v68_v14, 1  ;;  %v75_v17 = vrot.slane %v74_v15, 1 }
  0x36   :  { %v70_v18 = vadd.f32 %v69_v16, %v68_v14  ;;  %v76_v19 = vadd.f32 %v75_v17, %v74_v15 }
  0x38   :  { %v80_v20 = vsel %vm79_vm0, %v76_v19, %v70_v18 }
  0x39   :  { %v83_v21 = vsel %vm82_vm1, %v80_v20, 0.0 }
  0x3a   :  { %84 = vadd.xlane.f32.xlu0 %v83_v21 }
  0xc7   :  { %v85_v22 = vpop.xlane.xlu0 %84 }
  0xc8   :  { %v86_v23 = vmul.f32 0.0078125, %v85_v22 }
  0xca   :  { %v87_v24 = vadd.f32 1e-06, %v86_v23 }
  0xcc   :  { %133 = vrsqrt.f32 %v87_v24  ;;  %vm90_vm2 = vcmp.eq.f32.partialorder %v87_v24, inf  ;;  %v93_v27 = vand.u32 2147483648, %v87_v24  ;;  %vm92_vm4 = vcmp.eq.f32.partialorder %v87_v24, 0.0 }
  0xd6   :  { %v134_v25 = vpop.eup %133 }
  0xd7   :  { %v89_v26 = vmul.f32 %v134_v25, %v87_v24 }
  0xd9   :  { %v91_v28 = vsel %vm90_vm2, %v87_v24, %v89_v26 }
  0xda   :  { %v94_v29 = vsel %vm92_vm4, %v93_v27, %v91_v28 }
  0xdb   :  { %v96_v30 = vsel %vm95_vm3, %v94_v29, 0.0 }
  0xdc   :  { %97 = vadd.xlane.f32.xlu0 %v96_v30 }
 0x169   :  { %v98_v31 = vpop.xlane.xlu0 %97 }
 0x16a   :  { %v99_v32 = vrot.slane %v98_v31, 4 }
 0x16c   :  { %v100_v33 = vadd.f32 %v99_v32, %v98_v31 }
 0x16e   :  { %v101_v34 = vrot.slane %v100_v33, 2 }
 0x170   :  { %v102_v35 = vadd.f32 %v101_v34, %v100_v33 }
 0x172   :  { %v103_v36 = vrot.slane %v102_v35, 1 }
 0x174   :  { %v104_v37 = vadd.f32 %v103_v36, %v102_v35 }
 0x176   :  { %126 = vpush %v104_v37 }
 0x1a7   :  { %s127_s7 = spop %126 }
 0x1a8   :  { %v106_v38 = vstv %s127_s7 }
 0x1a9   :  { %v107_v39 = vmul.f32 0.5, %v106_v38 }
 0x1ab   :  { %109 = vst.msk [vmem:[#allocation8] sm:$0x1] %vm108_vm5, %v107_v39 }
 0x1ac   :  { %190 = shalt.err (!%p187_p6)
}
 0x1ad   :  { %s191_s12 = scalar_lea.hbm %s265_s2, 16 }
 0x1ae   :  { %p192_p7 = scmp.ne.s32.totalorder %s265_s2, %s191_s12  ;;  %p195_p8 = scmp.lt.u32.totalorder %s191_s12, %s265_s2 }
 0x1b0   :  { %p197_p9 = pnand %p195_p8, %p192_p7 }
 0x1b2   :  { %200 = shalt.err (!%p197_p9)
}
 0x1b3   :  { %119 = dma.vmem_to_hbm [thread:$0]  %s117_s6, 16, %s265_s2, [#allocation5]  }
 0x1b4   :  { %205 = dma.done.wait [#allocation5], 16  }
 0x1b5   :  { %206 = vsyncadd [#allocation5], 4294967280 }
 0x1b6   :  { %123 = vsyncpa [#allocation4], 1 }
 0x1b7   :  { %124 = vsyncpa [#allocation7], 1 }
 0x1b8   :  { %125 = vsyncpa [#allocation5], 1 }

</bundles_post_ra>
